<compile_context>
chip_gen: v7x
topology: tpu7x:2x2x1
jax: 0.10.0
libtpu: 0.0.40
codegen_flags: <defaults>
</compile_context>

<pallas_src>
import functools
import math

import jax
import jax.numpy as jnp
from jax.experimental import pallas as pl
from jax.experimental.pallas import tpu as pltpu

DW_KERNEL = 3
EMB_DIM = 48
N_TAGS = 18
LN_EPS = 1e-5
_SMALL_COLS = 16   # packed per-channel parameter slab: [EMB_DIM, _SMALL_COLS]


def _router_kernel(T, x_ref, mask_ref, smallp_ref,
                   pw1w_ref, pw2w_ref, linw_ref, out_ref):
    """One grid step over [E, R] activations, R = seqs_per_block * T columns."""
    x = x_ref[...]                                       # [E, R] f32
    R = x.shape[1]

    # Column position within its sequence.  Every block starts at a sequence
    # boundary (wrapper asserts rows_blk % T == 0), so (lane index % T) is the
    # in-sequence position; first/last positions zero the rolled-in neighbor,
    # reproducing Conv1d zero padding per sequence (and killing wrap-around /
    # cross-sequence leakage).
    pos = jax.lax.broadcasted_iota(jnp.int32, (1, R), 1) % T
    not_first = (pos != 0).astype(jnp.float32)           # [1, R]
    not_last = (pos != T - 1).astype(jnp.float32)        # [1, R]

    # Packed per-channel parameters: one [E, 16] slab, column j = one vector.
    # Hoisted once (JAX does not CSE broadcast_in_dim).
    sp = smallp_ref[...]
    dw1_w0, dw1_w1, dw1_w2 = sp[:, 0:1], sp[:, 1:2], sp[:, 2:3]
    dw1_b, pw1_b = sp[:, 3:4], sp[:, 4:5]
    ln1_g, ln1_b = sp[:, 5:6], sp[:, 6:7]
    dw2_w0, dw2_w1, dw2_w2 = sp[:, 7:8], sp[:, 8:9], sp[:, 9:10]
    dw2_b, pw2_b = sp[:, 10:11], sp[:, 11:12]
    ln2_g, ln2_b = sp[:, 12:13], sp[:, 13:14]
    lin_b = sp[0:N_TAGS, 14:15]                          # [N_TAGS, 1]

    pw1_w = pw1w_ref[...]                                # [E, E]      (out, in)
    pw2_w = pw2w_ref[...]                                # [E, E]
    lin_w = linw_ref[...]                                # [N_TAGS, E] (out, in)

    inv_e = 1.0 / EMB_DIM

    def depthwise(h, w0, w1, w2, b):
        # prev[:, i] = h[:, i-1]; nxt[:, i] = h[:, i+1]  (lane-axis rolls; the
        # XLU slot is separate from the VALU slot, so these are near-free).
        prev = pltpu.roll(h, 1, axis=1) * not_first
        nxt = pltpu.roll(h, R - 1, axis=1) * not_last
        return prev * w0 + h * w1 + nxt * w2 + b

    def layernorm(h, g, b):
        # Channels on sublanes; two independent reductions (E[h^2] - mu^2).
        mu = jnp.sum(h, axis=0, keepdims=True) * inv_e
        ex2 = jnp.sum(h * h, axis=0, keepdims=True) * inv_e
        var = ex2 - mu * mu
        return (h - mu) * jax.lax.rsqrt(var + LN_EPS) * g + b

    # block 1: dw -> ReLU -> pw -> LayerNorm   (dropout = identity in eval)
    h = jnp.maximum(depthwise(x, dw1_w0, dw1_w1, dw1_w2, dw1_b), 0.0)
    h = jnp.dot(pw1_w, h, preferred_element_type=jnp.float32) + pw1_b
    h = layernorm(h, ln1_g, ln1_b)

    # block 2
    h = jnp.maximum(depthwise(h, dw2_w0, dw2_w1, dw2_w2, dw2_b), 0.0)
    h = jnp.dot(pw2_w, h, preferred_element_type=jnp.float32) + pw2_b
    h = layernorm(h, ln2_g, ln2_b)

    # classifier + padding mask + log_softmax over tags (sublane axis)
    logits = jnp.dot(lin_w, h, preferred_element_type=jnp.float32) + lin_b
    keep = mask_ref[...] > 0.5                           # [1, R]
    logits = jnp.where(keep, logits, -10000.0)
    mx = jnp.max(logits, axis=0, keepdims=True)
    z = logits - mx
    lse = jnp.log(jnp.sum(jnp.exp(z), axis=0, keepdims=True))
    out_ref[...] = z - lse                               # lane-dense store


def _choose_blocking(B, T, rows_target):
    """Pick seqs/block so rows_blk = seqs*T is a multiple of T and of 128."""
    def rup(x, m):
        return -(-x // m) * m

    seq_align = 128 // math.gcd(T, 128)   # seqs multiple of this => rows % 128 == 0
    seqs = max(seq_align, rup(max(1, rows_target // T), seq_align))
    seqs = min(seqs, rup(B, seq_align))   # don't make blocks (much) larger than batch
    n_blocks = -(-B // seqs)
    # v7x has 2 TensorCores: prefer >= 2 grid steps when the batch allows it.
    if n_blocks == 1 and rup(B, seq_align) >= 2 * seq_align:
        seqs = rup(-(-B // 2), seq_align)
        n_blocks = -(-B // seqs)
    return seqs, n_blocks


def _pack_small_params(p):
    """Pack all per-channel vectors into one [EMB_DIM, _SMALL_COLS] slab."""
    E = EMB_DIM
    cols = [
        p["dw1_w"][0], p["dw1_w"][1], p["dw1_w"][2], p["dw1_b"],
        p["pw1_b"], p["ln1_g"], p["ln1_b"],
        p["dw2_w"][0], p["dw2_w"][1], p["dw2_w"][2], p["dw2_b"],
        p["pw2_b"], p["ln2_g"], p["ln2_b"],
        jnp.pad(p["lin_b"], (0, E - N_TAGS)),
        jnp.zeros((E,), jnp.float32),
    ]
    return jnp.stack([c.astype(jnp.float32) for c in cols], axis=1)   # [E, 16]


def depthwise_cnn_router(token_ids, mask, params, rows_target=2048):
    """token_ids [B,T] int32, mask [B,T] bool -> log-probs [B,T,N_TAGS] f32."""
    B, T = token_ids.shape
    E = EMB_DIM

    seqs_per_blk, n_blocks = _choose_blocking(B, T, rows_target)
    rows_blk = seqs_per_blk * T
    # Invariants the kernel relies on (roll-based conv + lane-dense blocks).
    assert rows_blk % T == 0, "every block must start at a sequence boundary"
    assert rows_blk % 128 == 0, "blocks must be lane-dense in the [E, rows] layout"

    B_pad = n_blocks * seqs_per_blk
    if B_pad != B:
        pad = B_pad - B
        token_ids = jnp.concatenate(
            [token_ids, jnp.zeros((pad, T), token_ids.dtype)], axis=0)
        mask = jnp.concatenate(
            [mask, jnp.zeros((pad, T), mask.dtype)], axis=0)
    R_pad = B_pad * T

    # Embedding gather (glue, plain JAX) directly into the transposed layout.
    # TODO(synk): fuse into the kernel with a VMEM-resident table.
    tok_flat = token_ids.reshape(R_pad)
    x_t = jnp.take(params["emb"].T.astype(jnp.float32), tok_flat, axis=1)  # [E, R_pad]
    mask_row = mask.astype(jnp.float32).reshape(1, R_pad)                  # [1, R_pad]

    smallp = _pack_small_params(params)                   # [E, 16]
    pw1_w = params["pw1_w"].astype(jnp.float32)           # [E, E]      (out, in)
    pw2_w = params["pw2_w"].astype(jnp.float32)           # [E, E]
    lin_w = params["lin_w"].astype(jnp.float32)           # [N_TAGS, E]

    in_specs = [
        pl.BlockSpec((E, rows_blk), lambda i: (0, i)),        # x^T tile
        pl.BlockSpec((1, rows_blk), lambda i: (0, i)),        # mask row
        pl.BlockSpec((E, _SMALL_COLS), lambda i: (0, 0)),     # packed small params
        pl.BlockSpec((E, E), lambda i: (0, 0)),               # pw1_w
        pl.BlockSpec((E, E), lambda i: (0, 0)),               # pw2_w
        pl.BlockSpec((N_TAGS, E), lambda i: (0, 0)),          # lin_w
    ]
    out_spec = pl.BlockSpec((N_TAGS, rows_blk), lambda i: (0, i))

    out_t = pl.pallas_call(
        functools.partial(_router_kernel, T),
        out_shape=jax.ShapeDtypeStruct((N_TAGS, R_pad), jnp.float32),
        grid_spec=pltpu.PrefetchScalarGridSpec(
            num_scalar_prefetch=0,
            grid=(n_blocks,),
            in_specs=in_specs,
            out_specs=out_spec),
        compiler_params=pltpu.CompilerParams(
            dimension_semantics=("parallel",)),
    )(x_t, mask_row, smallp, pw1_w, pw2_w, lin_w)

    # [N_TAGS, R_pad] -> [B, T, N_TAGS]
    return out_t.T.reshape(B_pad, T, N_TAGS)[:B]


def init_params(vocab_size, key):
    ks = jax.random.split(key, 11)

    def u(k, shape, s):
        return jax.random.uniform(k, shape, jnp.float32, -s, s)

    emb = jax.random.normal(ks[0], (vocab_size, EMB_DIM), jnp.float32)
    emb = emb.at[0].set(0.0)                       # padding_idx = 0
    kdw = 1.0 / (DW_KERNEL ** 0.5)
    kpw = 1.0 / (EMB_DIM ** 0.5)
    return dict(
        emb=emb,
        dw1_w=u(ks[1], (DW_KERNEL, EMB_DIM), kdw),   # [tap, channel]
        dw1_b=u(ks[2], (EMB_DIM,), kdw),
        pw1_w=u(ks[3], (EMB_DIM, EMB_DIM), kpw),     # [out, in]
        pw1_b=u(ks[4], (EMB_DIM,), kpw),
        ln1_g=jnp.ones((EMB_DIM,), jnp.float32),
        ln1_b=jnp.zeros((EMB_DIM,), jnp.float32),
        dw2_w=u(ks[5], (DW_KERNEL, EMB_DIM), kdw),
        dw2_b=u(ks[6], (EMB_DIM,), kdw),
        pw2_w=u(ks[7], (EMB_DIM, EMB_DIM), kpw),
        pw2_b=u(ks[8], (EMB_DIM,), kpw),
        ln2_g=jnp.ones((EMB_DIM,), jnp.float32),
        ln2_b=jnp.zeros((EMB_DIM,), jnp.float32),
        lin_w=u(ks[9], (N_TAGS, EMB_DIM), kpw),      # [out, in]
        lin_b=u(ks[10], (N_TAGS,), kpw),
    )


def reference(token_ids, mask, p):
    """Pure-JAX reference of the PyTorch forward (eval mode, f32 throughout)."""
    hi = jax.lax.Precision.HIGHEST
    x = jnp.take(p["emb"], token_ids, axis=0)            # [B,T,E]

    def dw(h, w, b):                                      # w [3,E], b [E]
        pad = jnp.pad(h, ((0, 0), (1, 1), (0, 0)))
        return pad[:, :-2] * w[0] + pad[:, 1:-1] * w[1] + pad[:, 2:] * w[2] + b

    def ln(h, g, b):
        mu = h.mean(-1, keepdims=True)
        var = ((h - mu) ** 2).mean(-1, keepdims=True)
        return (h - mu) / jnp.sqrt(var + LN_EPS) * g + b

    h = jax.nn.relu(dw(x, p["dw1_w"], p["dw1_b"]))
    h = jnp.dot(h, p["pw1_w"].T, precision=hi) + p["pw1_b"]
    h = ln(h, p["ln1_g"], p["ln1_b"])
    h = jax.nn.relu(dw(h, p["dw2_w"], p["dw2_b"]))
    h = jnp.dot(h, p["pw2_w"].T, precision=hi) + p["pw2_b"]
    h = ln(h, p["ln2_g"], p["ln2_b"])
    logits = jnp.dot(h, p["lin_w"].T, precision=hi) + p["lin_b"]
    logits = jnp.where(mask[..., None], logits, -10000.0)
    return jax.nn.log_softmax(logits, axis=-1)


if __name__ == "__main__":
    B, T, VOCAB = 2, 8, 50
    key = jax.random.PRNGKey(0)
    k_param, k_tok = jax.random.split(key)

    params = init_params(VOCAB, k_param)

    token_ids = jax.random.randint(k_tok, (B, T), 1, VOCAB, dtype=jnp.int32)
    mask = jnp.ones((B, T), dtype=bool)
    mask = mask.at[1, -3:].set(False)                    # pad tail of 2nd seq
    token_ids = jnp.where(mask, token_ids, 0)            # padding token = 0

    out = depthwise_cnn_router(token_ids, mask, params)
    out = jax.block_until_ready(out)

    ref = reference(token_ids, mask, params)
    assert out.shape == (B, T, N_TAGS)
    assert bool(jnp.all(jnp.isfinite(out)))
    assert bool(jnp.allclose(out, ref, atol=1e-3, rtol=1e-3)), "mismatch vs reference"

    print("KERNEL_OK")
</pallas_src>

<mosaic_0001>
module attributes {stable_mosaic.version = 11 : i64} {
  func.func @_router_kernel(%arg0: i32, %arg1: memref<48x128xf32, #tpu.memory_space<vmem>>, %arg2: memref<1x128xf32, #tpu.memory_space<vmem>>, %arg3: memref<48x16xf32, #tpu.memory_space<vmem>>, %arg4: memref<48x48xf32, #tpu.memory_space<vmem>>, %arg5: memref<48x48xf32, #tpu.memory_space<vmem>>, %arg6: memref<18x48xf32, #tpu.memory_space<vmem>>, %arg7: memref<18x128xf32, #tpu.memory_space<vmem>>) attributes {dimension_semantics = [#tpu.dimension_semantics<parallel>], iteration_bounds = array<i64: 1>, scalar_prefetch = 0 : i64, scratch_operands = 0 : i64, tpu.core_type = #tpu.core_type<tc>, window_params = [{transform_indices = @transform_0, window_bounds = array<i64: 48, 128>}, {transform_indices = @transform_1, window_bounds = array<i64: 1, 128>}, {pipeline_mode = #tpu.pipeline_mode<synchronous>, transform_indices = @transform_2, window_bounds = array<i64: 48, 16>}, {pipeline_mode = #tpu.pipeline_mode<synchronous>, transform_indices = @transform_3, window_bounds = array<i64: 48, 48>}, {pipeline_mode = #tpu.pipeline_mode<synchronous>, transform_indices = @transform_4, window_bounds = array<i64: 48, 48>}, {pipeline_mode = #tpu.pipeline_mode<synchronous>, transform_indices = @transform_5, window_bounds = array<i64: 18, 48>}, {transform_indices = @transform_6, window_bounds = array<i64: 18, 128>}]} {
    %c0 = arith.constant 0 : index
    %c0_0 = arith.constant 0 : index
    %0 = vector.load %arg1[%c0, %c0_0] : memref<48x128xf32, #tpu.memory_space<vmem>>, vector<48x128xf32>
    %1 = tpu.iota {dimensions = array<i32: 1>} : vector<1x128xi32>
    %c8_i32 = arith.constant 8 : i32
    %c0_i32 = arith.constant 0 : i32
    %2 = arith.cmpi eq, %c8_i32, %c0_i32 : i32
    %c1_i32 = arith.constant 1 : i32
    %3 = arith.select %2, %c1_i32, %c8_i32 : i32
    %4 = vector.broadcast %3 : i32 to vector<1x128xi32>
    %5 = arith.remsi %1, %4 : vector<1x128xi32>
    %c0_i32_1 = arith.constant 0 : i32
    %6 = vector.broadcast %c0_i32_1 : i32 to vector<1x128xi32>
    %7 = arith.cmpi ne, %5, %6 : vector<1x128xi32>
    %c0_i32_2 = arith.constant 0 : i32
    %8 = vector.broadcast %c0_i32_2 : i32 to vector<1x128xi32>
    %9 = arith.cmpi slt, %5, %8 : vector<1x128xi32>
    %c0_i32_3 = arith.constant 0 : i32
    %10 = arith.cmpi slt, %3, %c0_i32_3 : i32
    %11 = vector.broadcast %10 : i1 to vector<1x128xi1>
    %12 = vector.broadcast %11 : vector<1x128xi1> to vector<1x128xi1>
    %13 = arith.xori %9, %12 : vector<1x128xi1>
    %14 = arith.andi %13, %7 : vector<1x128xi1>
    %15 = vector.broadcast %3 : i32 to vector<1x128xi32>
    %16 = arith.addi %5, %15 : vector<1x128xi32>
    %17 = arith.select %14, %16, %5 : vector<1x128xi1>, vector<1x128xi32>
    %c0_i32_4 = arith.constant 0 : i32
    %18 = vector.broadcast %c0_i32_4 : i32 to vector<1x128xi32>
    %19 = arith.cmpi ne, %17, %18 : vector<1x128xi32>
    %20 = arith.extui %19 : vector<1x128xi1> to vector<1x128xi32>
    %21 = arith.sitofp %20 : vector<1x128xi32> to vector<1x128xf32>
    %c7_i32 = arith.constant 7 : i32
    %22 = vector.broadcast %c7_i32 : i32 to vector<1x128xi32>
    %23 = arith.cmpi ne, %17, %22 : vector<1x128xi32>
    %24 = arith.extui %23 : vector<1x128xi1> to vector<1x128xi32>
    %25 = arith.sitofp %24 : vector<1x128xi32> to vector<1x128xf32>
    %c0_5 = arith.constant 0 : index
    %c0_6 = arith.constant 0 : index
    %26 = vector.load %arg3[%c0_5, %c0_6] : memref<48x16xf32, #tpu.memory_space<vmem>>, vector<48x16xf32>
    %27 = vector.extract_strided_slice %26 {offsets = [0, 0], sizes = [48, 1], strides = [1, 1]} : vector<48x16xf32> to vector<48x1xf32>
    %28 = vector.extract_strided_slice %26 {offsets = [0, 1], sizes = [48, 1], strides = [1, 1]} : vector<48x16xf32> to vector<48x1xf32>
    %29 = vector.extract_strided_slice %26 {offsets = [0, 2], sizes = [48, 1], strides = [1, 1]} : vector<48x16xf32> to vector<48x1xf32>
    %30 = vector.extract_strided_slice %26 {offsets = [0, 3], sizes = [48, 1], strides = [1, 1]} : vector<48x16xf32> to vector<48x1xf32>
    %31 = vector.extract_strided_slice %26 {offsets = [0, 4], sizes = [48, 1], strides = [1, 1]} : vector<48x16xf32> to vector<48x1xf32>
    %32 = vector.extract_strided_slice %26 {offsets = [0, 5], sizes = [48, 1], strides = [1, 1]} : vector<48x16xf32> to vector<48x1xf32>
    %33 = vector.extract_strided_slice %26 {offsets = [0, 6], sizes = [48, 1], strides = [1, 1]} : vector<48x16xf32> to vector<48x1xf32>
    %34 = vector.extract_strided_slice %26 {offsets = [0, 7], sizes = [48, 1], strides = [1, 1]} : vector<48x16xf32> to vector<48x1xf32>
    %35 = vector.extract_strided_slice %26 {offsets = [0, 8], sizes = [48, 1], strides = [1, 1]} : vector<48x16xf32> to vector<48x1xf32>
    %36 = vector.extract_strided_slice %26 {offsets = [0, 9], sizes = [48, 1], strides = [1, 1]} : vector<48x16xf32> to vector<48x1xf32>
    %37 = vector.extract_strided_slice %26 {offsets = [0, 10], sizes = [48, 1], strides = [1, 1]} : vector<48x16xf32> to vector<48x1xf32>
    %38 = vector.extract_strided_slice %26 {offsets = [0, 11], sizes = [48, 1], strides = [1, 1]} : vector<48x16xf32> to vector<48x1xf32>
    %39 = vector.extract_strided_slice %26 {offsets = [0, 12], sizes = [48, 1], strides = [1, 1]} : vector<48x16xf32> to vector<48x1xf32>
    %40 = vector.extract_strided_slice %26 {offsets = [0, 13], sizes = [48, 1], strides = [1, 1]} : vector<48x16xf32> to vector<48x1xf32>
    %41 = vector.extract_strided_slice %26 {offsets = [0, 14], sizes = [18, 1], strides = [1, 1]} : vector<48x16xf32> to vector<18x1xf32>
    %c0_7 = arith.constant 0 : index
    %c0_8 = arith.constant 0 : index
    %42 = vector.load %arg4[%c0_7, %c0_8] : memref<48x48xf32, #tpu.memory_space<vmem>>, vector<48x48xf32>
    %c0_9 = arith.constant 0 : index
    %c0_10 = arith.constant 0 : index
    %43 = vector.load %arg5[%c0_9, %c0_10] : memref<48x48xf32, #tpu.memory_space<vmem>>, vector<48x48xf32>
    %c0_11 = arith.constant 0 : index
    %c0_12 = arith.constant 0 : index
    %44 = vector.load %arg6[%c0_11, %c0_12] : memref<18x48xf32, #tpu.memory_space<vmem>>, vector<18x48xf32>
    %c1_i32_13 = arith.constant 1 : i32
    %45 = tpu.dynamic_rotate %0 by %c1_i32_13 dim 1 : vector<48x128xf32>, i32 -> vector<48x128xf32>
    %46 = vector.broadcast %21 : vector<1x128xf32> to vector<48x128xf32>
    %47 = arith.mulf %45, %46 : vector<48x128xf32>
    %c127_i32 = arith.constant 127 : i32
    %48 = tpu.dynamic_rotate %0 by %c127_i32 dim 1 : vector<48x128xf32>, i32 -> vector<48x128xf32>
    %49 = vector.broadcast %25 : vector<1x128xf32> to vector<48x128xf32>
    %50 = arith.mulf %48, %49 : vector<48x128xf32>
    %51 = vector.broadcast %27 : vector<48x1xf32> to vector<48x128xf32>
    %52 = arith.mulf %47, %51 : vector<48x128xf32>
    %53 = vector.broadcast %28 : vector<48x1xf32> to vector<48x128xf32>
    %54 = arith.mulf %0, %53 : vector<48x128xf32>
    %55 = arith.addf %52, %54 : vector<48x128xf32>
    %56 = vector.broadcast %29 : vector<48x1xf32> to vector<48x128xf32>
    %57 = arith.mulf %50, %56 : vector<48x128xf32>
    %58 = arith.addf %55, %57 : vector<48x128xf32>
    %59 = vector.broadcast %30 : vector<48x1xf32> to vector<48x128xf32>
    %60 = arith.addf %58, %59 : vector<48x128xf32>
    %cst = arith.constant 0.000000e+00 : f32
    %61 = vector.broadcast %cst : f32 to vector<48x128xf32>
    %62 = arith.maximumf %60, %61 : vector<48x128xf32>
    %cst_14 = arith.constant dense<0.000000e+00> : vector<48x128xf32>
    %63 = tpu.matmul %42, %62, %cst_14 {dimension_numbers = #tpu.dot_dimension_numbers<[1], [0], [0], [1], [0, 0, 1, 1], [], []>} : vector<48x48xf32>, vector<48x128xf32>, vector<48x128xf32> -> vector<48x128xf32>
    %64 = vector.broadcast %31 : vector<48x1xf32> to vector<48x128xf32>
    %65 = arith.addf %63, %64 : vector<48x128xf32>
    %cst_15 = arith.constant dense<0.000000e+00> : vector<128xf32>
    %66 = vector.multi_reduction <add>, %65, %cst_15 [0] : vector<48x128xf32> to vector<128xf32>
    %67 = vector.shape_cast %66 : vector<128xf32> to vector<1x128xf32>
    %cst_16 = arith.constant 0.020833334 : f32
    %68 = vector.broadcast %cst_16 : f32 to vector<1x128xf32>
    %69 = arith.mulf %67, %68 : vector<1x128xf32>
    %70 = arith.mulf %65, %65 : vector<48x128xf32>
    %cst_17 = arith.constant dense<0.000000e+00> : vector<128xf32>
    %71 = vector.multi_reduction <add>, %70, %cst_17 [0] : vector<48x128xf32> to vector<128xf32>
    %72 = vector.shape_cast %71 : vector<128xf32> to vector<1x128xf32>
    %cst_18 = arith.constant 0.020833334 : f32
    %73 = vector.broadcast %cst_18 : f32 to vector<1x128xf32>
    %74 = arith.mulf %72, %73 : vector<1x128xf32>
    %75 = arith.mulf %69, %69 : vector<1x128xf32>
    %76 = arith.subf %74, %75 : vector<1x128xf32>
    %77 = vector.broadcast %69 : vector<1x128xf32> to vector<48x128xf32>
    %78 = arith.subf %65, %77 : vector<48x128xf32>
    %cst_19 = arith.constant 9.99999974E-6 : f32
    %79 = vector.broadcast %cst_19 : f32 to vector<1x128xf32>
    %80 = arith.addf %76, %79 : vector<1x128xf32>
    %81 = math.rsqrt %80 : vector<1x128xf32>
    %82 = vector.broadcast %81 : vector<1x128xf32> to vector<48x128xf32>
    %83 = arith.mulf %78, %82 : vector<48x128xf32>
    %84 = vector.broadcast %32 : vector<48x1xf32> to vector<48x128xf32>
    %85 = arith.mulf %83, %84 : vector<48x128xf32>
    %86 = vector.broadcast %33 : vector<48x1xf32> to vector<48x128xf32>
    %87 = arith.addf %85, %86 : vector<48x128xf32>
    %c1_i32_20 = arith.constant 1 : i32
    %88 = tpu.dynamic_rotate %87 by %c1_i32_20 dim 1 : vector<48x128xf32>, i32 -> vector<48x128xf32>
    %89 = vector.broadcast %21 : vector<1x128xf32> to vector<48x128xf32>
    %90 = arith.mulf %88, %89 : vector<48x128xf32>
    %c127_i32_21 = arith.constant 127 : i32
    %91 = tpu.dynamic_rotate %87 by %c127_i32_21 dim 1 : vector<48x128xf32>, i32 -> vector<48x128xf32>
    %92 = vector.broadcast %25 : vector<1x128xf32> to vector<48x128xf32>
    %93 = arith.mulf %91, %92 : vector<48x128xf32>
    %94 = vector.broadcast %34 : vector<48x1xf32> to vector<48x128xf32>
    %95 = arith.mulf %90, %94 : vector<48x128xf32>
    %96 = vector.broadcast %35 : vector<48x1xf32> to vector<48x128xf32>
    %97 = arith.mulf %87, %96 : vector<48x128xf32>
    %98 = arith.addf %95, %97 : vector<48x128xf32>
    %99 = vector.broadcast %36 : vector<48x1xf32> to vector<48x128xf32>
    %100 = arith.mulf %93, %99 : vector<48x128xf32>
    %101 = arith.addf %98, %100 : vector<48x128xf32>
    %102 = vector.broadcast %37 : vector<48x1xf32> to vector<48x128xf32>
    %103 = arith.addf %101, %102 : vector<48x128xf32>
    %cst_22 = arith.constant 0.000000e+00 : f32
    %104 = vector.broadcast %cst_22 : f32 to vector<48x128xf32>
    %105 = arith.maximumf %103, %104 : vector<48x128xf32>
    %cst_23 = arith.constant dense<0.000000e+00> : vector<48x128xf32>
    %106 = tpu.matmul %43, %105, %cst_23 {dimension_numbers = #tpu.dot_dimension_numbers<[1], [0], [0], [1], [0, 0, 1, 1], [], []>} : vector<48x48xf32>, vector<48x128xf32>, vector<48x128xf32> -> vector<48x128xf32>
    %107 = vector.broadcast %38 : vector<48x1xf32> to vector<48x128xf32>
    %108 = arith.addf %106, %107 : vector<48x128xf32>
    %cst_24 = arith.constant dense<0.000000e+00> : vector<128xf32>
    %109 = vector.multi_reduction <add>, %108, %cst_24 [0] : vector<48x128xf32> to vector<128xf32>
    %110 = vector.shape_cast %109 : vector<128xf32> to vector<1x128xf32>
    %cst_25 = arith.constant 0.020833334 : f32
    %111 = vector.broadcast %cst_25 : f32 to vector<1x128xf32>
    %112 = arith.mulf %110, %111 : vector<1x128xf32>
    %113 = arith.mulf %108, %108 : vector<48x128xf32>
    %cst_26 = arith.constant dense<0.000000e+00> : vector<128xf32>
    %114 = vector.multi_reduction <add>, %113, %cst_26 [0] : vector<48x128xf32> to vector<128xf32>
    %115 = vector.shape_cast %114 : vector<128xf32> to vector<1x128xf32>
    %cst_27 = arith.constant 0.020833334 : f32
    %116 = vector.broadcast %cst_27 : f32 to vector<1x128xf32>
    %117 = arith.mulf %115, %116 : vector<1x128xf32>
    %118 = arith.mulf %112, %112 : vector<1x128xf32>
    %119 = arith.subf %117, %118 : vector<1x128xf32>
    %120 = vector.broadcast %112 : vector<1x128xf32> to vector<48x128xf32>
    %121 = arith.subf %108, %120 : vector<48x128xf32>
    %cst_28 = arith.constant 9.99999974E-6 : f32
    %122 = vector.broadcast %cst_28 : f32 to vector<1x128xf32>
    %123 = arith.addf %119, %122 : vector<1x128xf32>
    %124 = math.rsqrt %123 : vector<1x128xf32>
    %125 = vector.broadcast %124 : vector<1x128xf32> to vector<48x128xf32>
    %126 = arith.mulf %121, %125 : vector<48x128xf32>
    %127 = vector.broadcast %39 : vector<48x1xf32> to vector<48x128xf32>
    %128 = arith.mulf %126, %127 : vector<48x128xf32>
    %129 = vector.broadcast %40 : vector<48x1xf32> to vector<48x128xf32>
    %130 = arith.addf %128, %129 : vector<48x128xf32>
    %cst_29 = arith.constant dense<0.000000e+00> : vector<18x128xf32>
    %131 = tpu.matmul %44, %130, %cst_29 {dimension_numbers = #tpu.dot_dimension_numbers<[1], [0], [0], [1], [0, 0, 1, 1], [], []>} : vector<18x48xf32>, vector<48x128xf32>, vector<18x128xf32> -> vector<18x128xf32>
    %132 = vector.broadcast %41 : vector<18x1xf32> to vector<18x128xf32>
    %133 = arith.addf %131, %132 : vector<18x128xf32>
    %c0_30 = arith.constant 0 : index
    %c0_31 = arith.constant 0 : index
    %134 = vector.load %arg2[%c0_30, %c0_31] : memref<1x128xf32, #tpu.memory_space<vmem>>, vector<1x128xf32>
    %cst_32 = arith.constant 5.000000e-01 : f32
    %135 = vector.broadcast %cst_32 : f32 to vector<1x128xf32>
    %136 = arith.cmpf ogt, %134, %135 : vector<1x128xf32>
    %cst_33 = arith.constant -1.000000e+04 : f32
    %137 = vector.shape_cast %136 : vector<1x128xi1> to vector<1x128xi1>
    %138 = vector.broadcast %137 : vector<1x128xi1> to vector<18x128xi1>
    %139 = vector.broadcast %cst_33 : f32 to vector<18x128xf32>
    %140 = arith.select %138, %133, %139 : vector<18x128xi1>, vector<18x128xf32>
    %cst_34 = arith.constant dense<0xFF800000> : vector<128xf32>
    %141 = vector.multi_reduction <maximumf>, %140, %cst_34 [0] : vector<18x128xf32> to vector<128xf32>
    %142 = vector.shape_cast %141 : vector<128xf32> to vector<1x128xf32>
    %143 = vector.broadcast %142 : vector<1x128xf32> to vector<18x128xf32>
    %144 = arith.subf %140, %143 : vector<18x128xf32>
    %145 = math.exp %144 : vector<18x128xf32>
    %cst_35 = arith.constant dense<0.000000e+00> : vector<128xf32>
    %146 = vector.multi_reduction <add>, %145, %cst_35 [0] : vector<18x128xf32> to vector<128xf32>
    %147 = vector.shape_cast %146 : vector<128xf32> to vector<1x128xf32>
    %148 = math.log %147 : vector<1x128xf32>
    %149 = vector.broadcast %148 : vector<1x128xf32> to vector<18x128xf32>
    %150 = arith.subf %144, %149 : vector<18x128xf32>
    %c0_36 = arith.constant 0 : index
    %c0_37 = arith.constant 0 : index
    %151 = vector.load %arg7[%c0_36, %c0_37] : memref<18x128xf32, #tpu.memory_space<vmem>>, vector<18x128xf32>
    tpu.vector_store %arg7[%c0_36, %c0_37], %150 {strides = array<i32>} : memref<18x128xf32, #tpu.memory_space<vmem>>, vector<18x128xf32>,
    return
  }
  func.func @transform_0(%arg0: i32) -> (i32, i32) {
    %c0_i32 = arith.constant 0 : i32
    %c0_i32_0 = arith.constant 0 : i32
    return %c0_i32, %arg0 : i32, i32
  }
  func.func @transform_1(%arg0: i32) -> (i32, i32) {
    %c0_i32 = arith.constant 0 : i32
    %c0_i32_0 = arith.constant 0 : i32
    return %c0_i32, %arg0 : i32, i32
  }
  func.func @transform_2(%arg0: i32) -> (i32, i32) {
    %c0_i32 = arith.constant 0 : i32
    %c0_i32_0 = arith.constant 0 : i32
    %c0_i32_1 = arith.constant 0 : i32
    return %c0_i32, %c0_i32_0 : i32, i32
  }
  func.func @transform_3(%arg0: i32) -> (i32, i32) {
    %c0_i32 = arith.constant 0 : i32
    %c0_i32_0 = arith.constant 0 : i32
    %c0_i32_1 = arith.constant 0 : i32
    return %c0_i32, %c0_i32_0 : i32, i32
  }
  func.func @transform_4(%arg0: i32) -> (i32, i32) {
    %c0_i32 = arith.constant 0 : i32
    %c0_i32_0 = arith.constant 0 : i32
    %c0_i32_1 = arith.constant 0 : i32
    return %c0_i32, %c0_i32_0 : i32, i32
  }
  func.func @transform_5(%arg0: i32) -> (i32, i32) {
    %c0_i32 = arith.constant 0 : i32
    %c0_i32_0 = arith.constant 0 : i32
    %c0_i32_1 = arith.constant 0 : i32
    return %c0_i32, %c0_i32_0 : i32, i32
  }
  func.func @transform_6(%arg0: i32) -> (i32, i32) {
    %c0_i32 = arith.constant 0 : i32
    %c0_i32_0 = arith.constant 0 : i32
    return %c0_i32, %arg0 : i32, i32
  }
}

</mosaic_0001>

<bundles_post_ra>
// kernel: tpu_custom_call.1
= control target key start
LH: loop header
LB: loop body
LE: loop exit
PB: predicated region body
PF: predicated region fallthrough
CT: control target
= control target key end

     0   :  { %11 = vsyncpa [#allocation3], 0  ;;  %s1909_s0 = inlined_call_operand.vmem [shape: f32[48,128], index: 0, kind: input, shape index: {}]   ;;  %s1910_s1 = inlined_call_operand.vmem [shape: f32[1,128], index: 1, kind: input, shape index: {}]   ;;  %s1911_s2 = inlined_call_operand.vmem [shape: f32[48,16], index: 2, kind: input, shape index: {}]   ;;  %s1912_s3 = inlined_call_operand.hbm [shape: f32[48,48], index: 3, kind: input, shape index: {}]   ;;  %s1913_s4 = inlined_call_operand.hbm [shape: f32[48,48], index: 4, kind: input, shape index: {}]   ;;  %s1914_s5 = inlined_call_operand.vmem [shape: f32[18,48], index: 5, kind: input, shape index: {}]   ;;  %s1915_s6 = inlined_call_operand.hbm [shape: f32[18,128], index: 6, kind: output, shape index: {}]  }
   0x1   :  { %12 = vsyncpa [#allocation6], 0 }
   0x2   :  { %13 = vsyncpa [#allocation4], 0  ;;  %s1418_s21 = smov [#allocation2]   ;;  %s1346_s25 = scalar_lea.hbm %s1912_s3, 768 }
   0x3   :  { %s25_s22 = sshll.u32 %s1418_s21, 4  ;;  %p1347_p0 = scmp.ne.s32.totalorder %s1912_s3, %s1346_s25  ;;  %s26_s22 = int_to_ptr.vmem [resolvable:$true] %s25_s22 }
   0x4   :  { %p1350_p1 = scmp.lt.u32.totalorder %s1346_s25, %s1912_s3 }
   0x6   :  { %p1352_p2 = pnand %p1350_p1, %p1347_p0 }
   0x8   :  { %1355 = shalt.err (!%p1352_p2)
}
   0x9   :  { %s1356_s30 = scalar_lea.vmem %s26_s22, 768  ;;  %p1361_p4 = scmp.lt.s32.totalorder %s26_s22, %s26_s22 }
   0xa   :  { %p1357_p3 = scmp.ne.s32.totalorder %s26_s22, %s1356_s30  ;;  %p1362_p5 = scmp.lt.s32.totalorder %s1356_s30, %s1356_s30 }
   0xc   :  { %p1363_p6 = por %p1362_p5, %p1361_p4 }
   0xe   :  { %p1364_p7 = pnand %p1363_p6, %p1357_p3 }
  0x10   :  { %1367 = shalt.err (!%p1364_p7)
}
  0x11   :  { %s1419_s7 = smov 128   ;;  %s1420_s8 = smov 8  }
  0x12   :  { %31 = dma.hbm_to_vmem [thread:$0]  %s1912_s3, 768, %s26_s22, [#allocation3], %s1419_s7, %s1419_s7, %s1420_s8  }
  0x13   :  { %s1421_s11 = smov [#allocation5]   ;;  %s1368_s15 = scalar_lea.hbm %s1913_s4, 768 }
  0x14   :  { %s37_s12 = sshll.u32 %s1421_s11, 4  ;;  %p1369_p8 = scmp.ne.s32.totalorder %s1913_s4, %s1368_s15  ;;  %s38_s12 = int_to_ptr.vmem [resolvable:$true] %s37_s12 }
  0x15   :  { %p1372_p9 = scmp.lt.u32.totalorder %s1368_s15, %s1913_s4 }
  0x17   :  { %p1374_p10 = pnand %p1372_p9, %p1369_p8 }
  0x19   :  { %1377 = shalt.err (!%p1374_p10)
}
  0x1a   :  { %s1378_s20 = scalar_lea.vmem %s38_s12, 768  ;;  %p1383_p12 = scmp.lt.s32.totalorder %s38_s12, %s38_s12 }
  0x1b   :  { %p1379_p11 = scmp.ne.s32.totalorder %s38_s12, %s1378_s20  ;;  %p1384_p13 = scmp.lt.s32.totalorder %s1378_s20, %s1378_s20 }
  0x1d   :  { %p1385_p0 = por %p1384_p13, %p1383_p12 }
  0x1f   :  { %p1386_p1 = pnand %p1385_p0, %p1379_p11 }
  0x21   :  { %1389 = shalt.err (!%p1386_p1)
}
  0x22   :  { %43 = dma.hbm_to_vmem [thread:$0]  %s1913_s4, 768, %s38_s12, [#allocation6], %s1419_s7, %s1419_s7, %s1420_s8  }
  0x23   :  { %1412 = dma.done.wait [#allocation3], 768  }
  0x24   :  { %1413 = vsyncadd [#allocation3], 4294966528 }
  0x25   :  { %1414 = dma.done.wait [#allocation6], 768  }
  0x26   :  { %1415 = vsyncadd [#allocation6], 4294966528  ;;  %v1422_v0 = vmov 1   ;;  %v1423_v1 = vmov 0   ;;  %v1512_v2 = vld [vmem:[%s1911_s2] sm:$0xff]  ;;  %v1519_v3 = vld [vmem:[%s1911_s2 + $0x8] sm:$0xff]  ;;  %v58_v28 = vlaneseq }
  0x27   :  { %1284 = vset.pattern.permute.xlu1 %v1422_v0  ;;  %1283 = vset.pattern.permute.xlu0 %v1423_v1  ;;  %v1526_v4 = vld [vmem:[%s1911_s2 + $0x18] sm:$0xff]  ;;  %v1424_v5 = vmov 2   ;;  %v1533_v6 = vld [vmem:[%s1909_s0] sm:$0xff]  ;;  %v1538_v7 = vld [vmem:[%s1911_s2 + $0x10] sm:$0xff]  ;;  %s1425_s9 = smov 1   ;;  %v1426_v11 = vmov 3  }
  0x28   :  { %172 = vperm.xlu1 %1284, %v1512_v2   ;;  %137 = vperm.xlu0 %1283, %v1512_v2   ;;  %v1546_v8 = vld [vmem:[%s1911_s2 + $0x20] sm:$0xff]  ;;  %v1553_v9 = vld [vmem:[%s1911_s2 + $0x28] sm:$0xff]  ;;  %s1427_s2 = smov 127   ;;  %v1590_v13 = vld [vmem:[%s1909_s0 + $0x10] sm:$0xff]  ;;  %vm303_vm0 = vcmask 392192   ;;  %v1428_v17 = vmov 4  }
  0x29   :  { %v1561_v10 = vld [vmem:[%s1909_s0 + $0x8] sm:$0xff]  ;;  %v1580_v12 = vld [vmem:[%s1909_s0 + $0x20] sm:$0xff]  ;;  %v1599_v14 = vld [vmem:[%s1909_s0 + $0x18] sm:$0xff]  ;;  %v1429_v20 = vmov 5   ;;  %v1430_v21 = vmov 6   ;;  %v1431_v30 = vmov 7  }
  0x2a   :  { %v1612_v15 = vld [vmem:[%s1909_s0 + $0x28] sm:$0xff]  ;;  %v84_v16 = vld [vmem:[#allocation2] sm:$0xff]  ;;  %v59_v32 = vand.u32 127, %v58_v28  ;;  %v1432_v38 = vmov 0.0   ;;  %v1433_v41 = vmov 8   ;;  %v1434_v59 = vmov 9  }
  0x2b   :  { %1168 = vmatprep.mubr.msk.f32.mxu0 %vm303_vm0, %v84_v16  ;;  %vm1440_vm3 = vmmov 0   ;;  %vm1052_vm6 = vcmask 1041408  }
  0x2c   :  { %176 = vperm.xlu1 %1284, %v1519_v3   ;;  %142 = vperm.xlu0 %1283, %v1519_v3   ;;  %v64_v34 = vand.u32 7, %v59_v32 }
  0x2e   :  { %vm72_vm1 = vcmp.ne.s32.totalorder %v64_v34, 0  ;;  %vm75_vm2 = vcmp.ne.s32.totalorder %v64_v34, 7 }
  0x2f   :  { %v1661_v39 = vsel %vm72_vm1, 1.0, %v1432_v38  ;;  %v1671_v45 = vsel %vm75_vm2, 1.0, %v1432_v38 }
  0x30   :  { %1285 = vset.pattern.permute.xlu1 %v1424_v5  ;;  %152 = vperm.xlu0 %1283, %v1526_v4  }
  0x31   :  { %212 = vperm.xlu1 %1285, %v1519_v3  }
  0x34   :  { %99 = vrot.lane.b32.xlu0 %v1533_v6, %s1425_s9 }
  0x35   :  { %1286 = vset.pattern.permute.xlu1 %v1423_v1 }
  0x36   :  { %147 = vperm.xlu1 %1286, %v1538_v7  }
  0x38   :  { %157 = vperm.xlu0 %1283, %v1546_v8  }
  0x3a   :  { %1287 = vset.pattern.permute.xlu1 %v1422_v0 }
  0x3b   :  { %180 = vperm.xlu1 %1287, %v1538_v7  }
  0x3c   :  { %1292 = vset.pattern.permute.xlu0 %v1422_v0 }
  0x3d   :  { %192 = vperm.xlu0 %1292, %v1553_v9  }
  0x3f   :  { %184 = vperm.xlu1 %1287, %v1526_v4  }
  0x41   :  { %1293 = vset.pattern.permute.xlu0 %v1424_v5 }
  0x42   :  { %208 = vperm.xlu0 %1293, %v1512_v2  }
  0x43   :  { %101 = vrot.lane.b32.xlu1 %v1561_v10, %s1425_s9 }
  0x44   :  { %1288 = vset.pattern.permute.xlu1 %v1424_v5 }
  0x46   :  { %216 = vperm.xlu0 %1293, %v1538_v7  }
  0x47   :  { %220 = vperm.xlu1 %1288, %v1526_v4  }
  0x4a   :  { %224 = vperm.xlu0 %1293, %v1546_v8  }
  0x4b   :  { %1289 = vset.pattern.permute.xlu1 %v1426_v11 }
  0x4c   :  { %244 = vperm.xlu1 %1289, %v1512_v2  }
  0x4e   :  { %1294 = vset.pattern.permute.xlu0 %v1426_v11 }
  0x4f   :  { %248 = vperm.xlu0 %1294, %v1519_v3  }
  0x50   :  { %117 = vrot.lane.b32.xlu1 %v1533_v6, %s1427_s2 }
  0x51   :  { %1290 = vset.pattern.permute.xlu1 %v1423_v1 }
  0x53   :  { %256 = vperm.xlu0 %1294, %v1526_v4  }
  0x54   :  { %119 = vrot.lane.b32.xlu1 %v1561_v10, %s1427_s2 }
  0x57   :  { %107 = vrot.lane.b32.xlu0 %v1580_v12, %s1425_s9 }
  0x58   :  { %162 = vperm.xlu1 %1290, %v1553_v9  }
  0x5b   :  { %260 = vperm.xlu0 %1294, %v1546_v8  }
  0x5c   :  { %1291 = vset.pattern.permute.xlu1 %v1422_v0 }
  0x5d   :  { %188 = vperm.xlu1 %1291, %v1546_v8  }
  0x5f   :  { %125 = vrot.lane.b32.xlu0 %v1580_v12, %s1427_s2 }
  0x60   :  { %1297 = vset.pattern.permute.xlu0 %v1428_v17 }
  0x61   :  { %103 = vrot.lane.b32.xlu1 %v1590_v13, %s1425_s9 }
  0x62   :  { %1295 = vset.pattern.permute.xlu1 %v1424_v5 }
  0x63   :  { %280 = vperm.xlu0 %1297, %v1512_v2  }
  0x65   :  { %105 = vrot.lane.b32.xlu1 %v1599_v14, %s1425_s9 }
  0x67   :  { %292 = vperm.xlu0 %1297, %v1526_v4  }
  0x69   :  { %228 = vperm.xlu1 %1295, %v1553_v9  }
  0x6b   :  { %300 = vperm.xlu0 %1297, %v1553_v9  }
  0x6d   :  { %1296 = vset.pattern.permute.xlu1 %v1426_v11 }
  0x6e   :  { %252 = vperm.xlu1 %1296, %v1538_v7  }
  0x6f   :  { %1302 = vset.pattern.permute.xlu0 %v1430_v21 }
  0x70   :  { %502 = vperm.xlu0 %1302, %v1538_v7  }
  0x72   :  { %121 = vrot.lane.b32.xlu1 %v1590_v13, %s1427_s2 }
  0x74   :  { %1303 = vset.pattern.permute.xlu0 %v1429_v20 }
  0x75   :  { %468 = vperm.xlu0 %1303, %v1519_v3  }
  0x76   :  { %123 = vrot.lane.b32.xlu1 %v1599_v14, %s1427_s2 }
  0x79   :  { %472 = vperm.xlu0 %1303, %v1538_v7  }
  0x7a   :  { %109 = vrot.lane.b32.xlu1 %v1612_v15, %s1425_s9 }
  0x7d   :  { %484 = vperm.xlu0 %1303, %v1553_v9  }
  0x7e   :  { %264 = vperm.xlu1 %1296, %v1553_v9  }
  0x81   :  { %1307 = vset.pattern.permute.xlu0 %v1431_v30 }
  0x82   :  { %127 = vrot.lane.b32.xlu1 %v1612_v15, %s1427_s2  ;;  %560 = vperm.xlu0 %1307, %v1512_v2  }
  0x83   :  { %1298 = vset.pattern.permute.xlu1 %v1428_v17  ;;  %v1435_v17 = vmov 10  }
  0x86   :  { %284 = vperm.xlu1 %1298, %v1519_v3   ;;  %568 = vperm.xlu0 %1307, %v1538_v7  }
  0x8a   :  { %288 = vperm.xlu1 %1298, %v1538_v7   ;;  %576 = vperm.xlu0 %1307, %v1546_v8  }
  0x8e   :  { %296 = vperm.xlu1 %1298, %v1546_v8   ;;  %1315 = vset.pattern.permute.xlu0 %v1433_v41 }
  0x8f   :  { %594 = vperm.xlu0 %1315, %v1519_v3  }
  0x92   :  { %1299 = vset.pattern.permute.xlu1 %v1429_v20 }
  0x93   :  { %464 = vperm.xlu1 %1299, %v1512_v2   ;;  %602 = vperm.xlu0 %1315, %v1526_v4  }
  0x97   :  { %1300 = vset.pattern.permute.xlu1 %v1430_v21  ;;  %610 = vperm.xlu0 %1315, %v1553_v9  }
  0x98   :  { %494 = vperm.xlu1 %1300, %v1512_v2  }
  0x9b   :  { %1318 = vset.pattern.permute.xlu0 %v1434_v59 }
  0x9c   :  { %498 = vperm.xlu1 %1300, %v1519_v3   ;;  %634 = vperm.xlu0 %1318, %v1538_v7  }
  0xa0   :  { %1301 = vset.pattern.permute.xlu1 %v1429_v20  ;;  %642 = vperm.xlu0 %1318, %v1546_v8  }
  0xa1   :  { %476 = vperm.xlu1 %1301, %v1526_v4  }
  0xa4   :  { %1319 = vset.pattern.permute.xlu0 %v1435_v17 }
  0xa5   :  { %1304 = vset.pattern.permute.xlu1 %v1430_v21  ;;  %666 = vperm.xlu0 %1319, %v1519_v3  }
  0xa6   :  { %506 = vperm.xlu1 %1304, %v1526_v4  }
  0xa7   :  { %v173_v18 = vpop.permute.xlu1 %172  ;;  %v138_v19 = vpop.permute.xlu0 %137 }
  0xa8   :  { %v195_v49 = vmul.f32 %v173_v18, %v1533_v6 }
  0xa9   :  { %674 = vperm.xlu0 %1319, %v1526_v4  }
  0xaa   :  { %1305 = vset.pattern.permute.xlu1 %v1429_v20 }
  0xab   :  { %v1628_v22 = vpop.permute.xlu1 %176  ;;  %v143_v23 = vpop.permute.xlu0 %142  ;;  %480 = vperm.xlu1 %1305, %v1546_v8  }
  0xac   :  { %v196_v56 = vmul.f32 %v1628_v22, %v1561_v10 }
  0xad   :  { %678 = vperm.xlu0 %1319, %v1546_v8  }
  0xaf   :  { %v1634_v25 = vpop.permute.xlu0 %152  ;;  %1306 = vset.pattern.permute.xlu1 %v1430_v21 }
  0xb0   :  { %v1632_v24 = vpop.permute.xlu1 %212  ;;  %510 = vperm.xlu1 %1306, %v1546_v8  }
  0xb3   :  { %v100_v27 = vpop.permute.xlu0 %99 }
  0xb4   :  { %v111_v42 = vmul.f32 %v1661_v39, %v100_v27  ;;  %514 = vperm.xlu1 %1306, %v1553_v9  }
  0xb5   :  { %v1638_v26 = vpop.permute.xlu1 %147 }
  0xb6   :  { %v165_v46 = vmul.f32 %v138_v19, %v111_v42 }
  0xb7   :  { %v1645_v31 = vpop.permute.xlu0 %157 }
  0xb8   :  { %1308 = vset.pattern.permute.xlu1 %v1431_v30  ;;  %v201_v51 = vadd.f32 %v195_v49, %v165_v46 }
  0xb9   :  { %564 = vperm.xlu1 %1308, %v1519_v3  }
  0xba   :  { %v1642_v29 = vpop.permute.xlu1 %180 }
  0xbb   :  { %v197_v42 = vmul.f32 %v1642_v29, %v1590_v13 }
  0xbc   :  { %v1653_v35 = vpop.permute.xlu0 %192 }
  0xbd   :  { %1309 = vset.pattern.permute.xlu1 %v1433_v41 }
  0xbe   :  { %v1650_v33 = vpop.permute.xlu1 %184  ;;  %590 = vperm.xlu1 %1309, %v1512_v2  }
  0xc1   :  { %v209_v40 = vpop.permute.xlu0 %208 }
  0xc2   :  { %v102_v36 = vpop.permute.xlu1 %101  ;;  %1310 = vset.pattern.permute.xlu1 %v1434_v59 }
  0xc3   :  { %v112_v47 = vmul.f32 %v1661_v39, %v102_v36  ;;  %626 = vperm.xlu1 %1310, %v1512_v2  }
  0xc5   :  { %v1668_v44 = vpop.permute.xlu0 %216  ;;  %v166_v52 = vmul.f32 %v143_v23, %v112_v47 }
  0xc6   :  { %v1657_v37 = vpop.permute.xlu1 %220 }
  0xc7   :  { %v202_v60 = vadd.f32 %v196_v56, %v166_v52  ;;  %630 = vperm.xlu1 %1310, %v1519_v3  }
  0xc9   :  { %v1679_v54 = vpop.permute.xlu0 %224 }
  0xcb   :  { %v245_v43 = vpop.permute.xlu1 %244  ;;  %1311 = vset.pattern.permute.xlu1 %v1431_v30 }
  0xcc   :  { %572 = vperm.xlu1 %1311, %v1526_v4  }
  0xce   :  { %v249_v5 = vpop.permute.xlu0 %248 }
  0xcf   :  { %v118_v48 = vpop.permute.xlu1 %117 }
  0xd0   :  { %v129_v50 = vmul.f32 %v1671_v45, %v118_v48  ;;  %1312 = vset.pattern.permute.xlu1 %v1433_v41 }
  0xd1   :  { %598 = vperm.xlu1 %1312, %v1538_v7  }
  0xd2   :  { %v231_v53 = vmul.f32 %v209_v40, %v129_v50  ;;  %v257_v21 = vpop.permute.xlu0 %256 }
  0xd3   :  { %v120_v55 = vpop.permute.xlu1 %119 }
  0xd4   :  { %v237_v57 = vadd.f32 %v231_v53, %v201_v51  ;;  %v130_v58 = vmul.f32 %v1671_v45, %v120_v55 }
  0xd5   :  { %1313 = vset.pattern.permute.xlu1 %v1434_v59 }
  0xd6   :  { %v232_v61 = vmul.f32 %v1632_v24, %v130_v58  ;;  %v267_v0 = vadd.f32 %v245_v43, %v237_v57  ;;  %v108_v23 = vpop.permute.xlu0 %107  ;;  %638 = vperm.xlu1 %1313, %v1526_v4  }
  0xd7   :  { %v1689_v62 = vpop.permute.xlu1 %162 }
  0xd8   :  { %v238_v63 = vadd.f32 %v232_v61, %v202_v60  ;;  %v273_v11 = vmax.f32 %v267_v0, 0.0 }
  0xda   :  { %v268_v6 = vadd.f32 %v249_v5, %v238_v63  ;;  %1314 = vset.pattern.permute.xlu1 %v1435_v17  ;;  %v261_v36 = vpop.permute.xlu0 %260 }
  0xdb   :  { %662 = vperm.xlu1 %1314, %v1512_v2  }
  0xdc   :  { %v189_v10 = vpop.permute.xlu1 %188  ;;  %v274_v16 = vmax.f32 %v268_v6, 0.0 }
  0xde   :  { %v1219_v18 = vpack.c.bf16 %v274_v16, %v273_v11  ;;  %v126_v52 = vpop.permute.xlu0 %125 }
  0xdf   :  { %1316 = vset.pattern.permute.xlu1 %v1431_v30 }
  0xe0   :  { %v104_v19 = vpop.permute.xlu1 %103  ;;  %1220 = vmatprep.subr.bf16.mxu0 %v1219_v18  ;;  %580 = vperm.xlu1 %1316, %v1553_v9  }
  0xe1   :  { %1222 = vmatpush3.bf16.msra.mxu0 %v1219_v18  ;;  %v113_v24 = vmul.f32 %v1661_v39, %v104_v19 }
  0xe3   :  { %v167_v32 = vmul.f32 %v1638_v26, %v113_v24  ;;  %v198_v26 = vmul.f32 %v1650_v33, %v1599_v14  ;;  %v199_v14 = vmul.f32 %v189_v10, %v1580_v12  ;;  %v200_v12 = vmul.f32 %v1653_v35, %v1612_v15  ;;  %v85_v15 = vld [vmem:[#allocation2 + $0x8] sm:$0xff]  ;;  %v86_v35 = vld [vmem:[#allocation2 + $0x10] sm:$0xff] }
  0xe4   :  { %v106_v20 = vpop.permute.xlu1 %105  ;;  %1317 = vset.pattern.permute.xlu1 %v1433_v41 }
  0xe5   :  { %v114_v34 = vmul.f32 %v1661_v39, %v106_v20  ;;  %v203_v46 = vadd.f32 %v197_v42, %v167_v32  ;;  %606 = vperm.xlu1 %1317, %v1546_v8   ;;  %v87_v20 = vld [vmem:[#allocation2 + $0x18] sm:$0xff] }
  0xe7   :  { %v168_v47 = vmul.f32 %v1634_v25, %v114_v34  ;;  %v115_v25 = vmul.f32 %v1661_v39, %v108_v23  ;;  %v281_v23 = vpop.permute.xlu0 %280 }
  0xe8   :  { %v229_v22 = vpop.permute.xlu1 %228 }
  0xe9   :  { %v204_v13 = vadd.f32 %v198_v26, %v168_v47  ;;  %v169_v58 = vmul.f32 %v1645_v31, %v115_v25  ;;  %1320 = vset.pattern.permute.xlu1 %v1434_v59 }
  0xea   :  { %646 = vperm.xlu1 %1320, %v1553_v9  }
  0xeb   :  { %v205_v63 = vadd.f32 %v199_v14, %v169_v58 }
  0xed   :  { %v253_v27 = vpop.permute.xlu1 %252 }
  0xee   :  { %1321 = vset.pattern.permute.xlu1 %v1435_v17  ;;  %v88_v17 = vld [vmem:[#allocation2 + $0x20] sm:$0xff] }
  0xef   :  { %670 = vperm.xlu1 %1321, %v1538_v7  }
  0xf1   :  { %v122_v40 = vpop.permute.xlu1 %121 }
  0xf2   :  { %v131_v43 = vmul.f32 %v1671_v45, %v122_v40  ;;  %v293_v40 = vpop.permute.xlu0 %292 }
  0xf3   :  { %682 = vperm.xlu1 %1321, %v1553_v9  }
  0xf4   :  { %v233_v48 = vmul.f32 %v1668_v44, %v131_v43  ;;  %v133_v44 = vmul.f32 %v1671_v45, %v126_v52 }
  0xf5   :  { %v124_v49 = vpop.permute.xlu1 %123 }
  0xf6   :  { %v239_v50 = vadd.f32 %v233_v48, %v203_v46  ;;  %v132_v51 = vmul.f32 %v1671_v45, %v124_v49 }
  0xf8   :  { %v234_v29 = vmul.f32 %v1657_v37, %v132_v51  ;;  %v269_v56 = vadd.f32 %v253_v27, %v239_v50  ;;  %v235_v37 = vmul.f32 %v1679_v54, %v133_v44 }
  0xf9   :  { %v110_v53 = vpop.permute.xlu1 %109 }
  0xfa   :  { %v240_v55 = vadd.f32 %v234_v29, %v204_v13  ;;  %v116_v30 = vmul.f32 %v1661_v39, %v110_v53  ;;  %v275_v60 = vmax.f32 %v269_v56, 0.0  ;;  %v241_v6 = vadd.f32 %v235_v37, %v205_v63  ;;  %v301_v53 = vpop.permute.xlu0 %300 }
  0xfc   :  { %v270_v33 = vadd.f32 %v257_v21, %v240_v55  ;;  %v170_v0 = vmul.f32 %v1689_v62, %v116_v30  ;;  %v271_v62 = vadd.f32 %v261_v36, %v241_v6  ;;  %v89_v21 = vld [vmem:[#allocation2 + $0x28] sm:$0xff] }
  0xfd   :  { %v265_v57 = vpop.permute.xlu1 %264 }
  0xfe   :  { %v276_v61 = vmax.f32 %v270_v33, 0.0  ;;  %v206_v31 = vadd.f32 %v200_v12, %v170_v0  ;;  %v277_v16 = vmax.f32 %v271_v62, 0.0 }
 0x100   :  { %v1223_v41 = vpack.c.bf16 %v276_v61, %v275_v60 }
 0x101   :  { %v128_v5 = vpop.permute.xlu1 %127 }
 0x102   :  { %v134_v10 = vmul.f32 %v1671_v45, %v128_v5  ;;  %1224 = vmatprep.subr.bf16.mxu0 %v1223_v41 }
 0x103   :  { %1226 = vmatpush3.bf16.msra.mxu0 %v1223_v41 }
 0x104   :  { %v236_v54 = vmul.f32 %v229_v22, %v134_v10 }
 0x105   :  { %v285_v22 = vpop.permute.xlu1 %284 }
 0x106   :  { %v242_v59 = vadd.f32 %v236_v54, %v206_v31 }
 0x108   :  { %v272_v11 = vadd.f32 %v265_v57, %v242_v59 }
 0x109   :  { %v289_v34 = vpop.permute.xlu1 %288 }
 0x10a   :  { %v278_v18 = vmax.f32 %v272_v11, 0.0 }
 0x10c   :  { %v1227_v19 = vpack.c.bf16 %v278_v18, %v277_v16 }
 0x10d   :  { %v297_v51 = vpop.permute.xlu1 %296 }
 0x10e   :  { %1228 = vmatprep.subr.bf16.mxu0 %v1227_v19 }
 0x10f   :  { %1230 = vmatpush3.bf16.msra.mxu0 %v1227_v19 }
 0x112   :  { %1169 = vmatmul.mubr.msk.f32.vlgmr.msra.gmra.mrb[0].mxu0 %vm303_vm0, %v85_v15  ;;  %v465_v37 = vpop.permute.xlu1 %464 }
 0x113   :  { %1171 = vmatprep.mubr.msk.f32.mxu0 %vm303_vm0, %v86_v35 }
 0x116   :  { %1172 = vmatmul.mubr.msk.f32.gmra.mrb[2].mxu0 %vm303_vm0, %v87_v20 }
 0x117   :  { %1174 = vmatprep.mubr.msk.f32.mxu0 %vm303_vm0, %v88_v17  ;;  %v495_v6 = vpop.permute.xlu1 %494 }
 0x11a   :  { %1175 = vmatmul.mubr.msk.f32.gmra.mrb[4].mxu0 %vm303_vm0, %v89_v21 }
 0x11b   :  { %v499_v16 = vpop.permute.xlu1 %498  ;;  %1210 = vmatprep.mubr.msk.f32.mxu0 %vm1440_vm3, %v1432_v38 }
 0x1e5   :  { %v1170_v24 = vpop.f32.mrb[0].mxu0 }
 0x1e6   :  { %v1743_v27 = vadd.f32 %v1170_v24, %v285_v22  ;;  %v388_v32 = vpop.f32.mrb[1].mxu0 }
 0x1e7   :  { %v389_v36 = vadd.f32 %v388_v32, %v281_v23 }
 0x1e8   :  { %v430_v42 = vmul.f32 %v1743_v27, %v1743_v27 }
 0x1e9   :  { %v417_v43 = vadd.f32 %v1743_v27, %v389_v36  ;;  %v429_v46 = vmul.f32 %v389_v36, %v389_v36  ;;  %v1173_v47 = vpop.f32.mrb[2].mxu0 }
 0x1ea   :  { %v404_v48 = vadd.f32 %v1173_v47, %v293_v40  ;;  %v398_v49 = vpop.f32.mrb[3].mxu0  ;;  %v477_v40 = vpop.permute.xlu1 %476 }
 0x1eb   :  { %v435_v26 = vadd.f32 %v430_v42, %v429_v46  ;;  %v399_v50 = vadd.f32 %v398_v49, %v289_v34  ;;  %v503_v49 = vpop.permute.xlu0 %502 }
 0x1ec   :  { %v432_v25 = vmul.f32 %v404_v48, %v404_v48 }
 0x1ed   :  { %v418_v52 = vadd.f32 %v417_v43, %v399_v50  ;;  %v431_v13 = vmul.f32 %v399_v50, %v399_v50  ;;  %v1176_v29 = vpop.f32.mrb[4].mxu0 }
 0x1ee   :  { %v408_v44 = vpop.f32.mrb[5].mxu0  ;;  %v414_v56 = vadd.f32 %v1176_v29, %v301_v53  ;;  %v507_v46 = vpop.permute.xlu1 %506 }
 0x1ef   :  { %v436_v55 = vadd.f32 %v435_v26, %v431_v13  ;;  %v409_v14 = vadd.f32 %v408_v44, %v297_v51  ;;  %v419_v30 = vadd.f32 %v418_v52, %v404_v48 }
 0x1f0   :  { %v434_v60 = vmul.f32 %v414_v56, %v414_v56 }
 0x1f1   :  { %v420_v33 = vadd.f32 %v419_v30, %v409_v14  ;;  %v433_v57 = vmul.f32 %v409_v14, %v409_v14  ;;  %v437_v58 = vadd.f32 %v436_v55, %v432_v25 }
 0x1f2   :  { %v481_v47 = vpop.permute.xlu1 %480 }
 0x1f3   :  { %v421_v61 = vadd.f32 %v420_v33, %v414_v56  ;;  %v438_v63 = vadd.f32 %v437_v58, %v433_v57 }
 0x1f5   :  { %v422_v0 = vrot.slane %v421_v61, 4  ;;  %v439_v41 = vadd.f32 %v438_v63, %v434_v60 }
 0x1f7   :  { %v423_v5 = vadd.f32 %v422_v0, %v421_v61  ;;  %v440_v12 = vrot.slane %v439_v41, 4 }
 0x1f9   :  { %v424_v10 = vrot.slane %v423_v5, 2  ;;  %v441_v31 = vadd.f32 %v440_v12, %v439_v41  ;;  %v90_v41 = vld [vmem:[#allocation5] sm:$0xff] }
 0x1fa   :  { %1189 = vmatprep.mubr.msk.f32.mxu1 %vm303_vm0, %v90_v41 }
 0x1fb   :  { %v425_v54 = vadd.f32 %v424_v10, %v423_v5  ;;  %v442_v59 = vrot.slane %v441_v31, 2 }
 0x1fd   :  { %v426_v62 = vrot.slane %v425_v54, 1  ;;  %v443_v11 = vadd.f32 %v442_v59, %v441_v31  ;;  %v1438_v59 = vmov 13  }
 0x1ff   :  { %v427_v18 = vadd.f32 %v426_v62, %v425_v54  ;;  %v444_v19 = vrot.slane %v443_v11, 1  ;;  %v1437_v54 = vmov 12  }
 0x201   :  { %v428_v15 = vmul.f32 0.020833334, %v427_v18  ;;  %v445_v35 = vadd.f32 %v444_v19, %v443_v11 }
 0x203   :  { %v446_v20 = vmul.f32 0.020833334, %v445_v35  ;;  %v447_v17 = vmul.f32 %v428_v15, %v428_v15  ;;  %v453_v21 = vsub.f32 %v409_v14, %v428_v15  ;;  %v449_v22 = vsub.f32 %v389_v36, %v428_v15 }
 0x204   :  { %v450_v23 = vsub.f32 %v1743_v27, %v428_v15  ;;  %v451_v24 = vsub.f32 %v399_v50, %v428_v15  ;;  %v454_v32 = vsub.f32 %v414_v56, %v428_v15  ;;  %v452_v34 = vsub.f32 %v404_v48, %v428_v15  ;;  %v511_v27 = vpop.permute.xlu1 %510  ;;  %v469_v48 = vpop.permute.xlu0 %468 }
 0x205   :  { %v448_v42 = vsub.f32 %v446_v20, %v447_v17 }
 0x207   :  { %v455_v43 = vadd.f32 1e-05, %v448_v42 }
 0x208   :  { %v473_v30 = vpop.permute.xlu0 %472  ;;  %v515_v63 = vpop.permute.xlu1 %514 }
 0x209   :  { %1334 = vrsqrt.f32 %v455_v43 }
 0x20c   :  { %v485_v60 = vpop.permute.xlu0 %484  ;;  %v565_v5 = vpop.permute.xlu1 %564 }
 0x210   :  { %v591_v12 = vpop.permute.xlu1 %590  ;;  %v561_v11 = vpop.permute.xlu0 %560 }
 0x213   :  { %v1335_v26 = vpop.eup %1334 }
 0x214   :  { %v461_v51 = vmul.f32 %v1335_v26, %v453_v21  ;;  %v457_v52 = vmul.f32 %v1335_v26, %v449_v22  ;;  %v458_v13 = vmul.f32 %v1335_v26, %v450_v23  ;;  %v459_v29 = vmul.f32 %v1335_v26, %v451_v24  ;;  %v627_v10 = vpop.permute.xlu1 %626  ;;  %v569_v18 = vpop.permute.xlu0 %568 }
 0x215   :  { %v462_v53 = vmul.f32 %v1335_v26, %v454_v32  ;;  %v460_v25 = vmul.f32 %v1335_v26, %v452_v34 }
 0x216   :  { %v487_v36 = vmul.f32 %v465_v37, %v457_v52  ;;  %v491_v44 = vmul.f32 %v481_v47, %v461_v51  ;;  %v488_v56 = vmul.f32 %v469_v48, %v458_v13  ;;  %v489_v33 = vmul.f32 %v473_v30, %v459_v29 }
 0x217   :  { %v490_v58 = vmul.f32 %v477_v40, %v460_v25  ;;  %v492_v61 = vmul.f32 %v485_v60, %v462_v53 }
 0x218   :  { %v1749_v50 = vadd.f32 %v495_v6, %v487_v36  ;;  %v1751_v55 = vadd.f32 %v511_v27, %v491_v44  ;;  %v1757_v14 = vadd.f32 %v499_v16, %v488_v56  ;;  %v1767_v57 = vadd.f32 %v503_v49, %v489_v33  ;;  %v631_v31 = vpop.permute.xlu1 %630  ;;  %v1805_v15 = vpop.permute.xlu0 %576 }
 0x219   :  { %v1771_v37 = vadd.f32 %v507_v46, %v490_v58  ;;  %v1779_v0 = vadd.f32 %v515_v63, %v492_v61  ;;  %v1436_v6 = vmov 11  }
 0x21a   :  { %531 = vrot.lane.b32.xlu0 %v1751_v55, %s1425_s9  ;;  %523 = vrot.lane.b32.xlu1 %v1749_v50, %s1425_s9  ;;  %v613_v13 = vmul.f32 %v591_v12, %v1749_v50 }
 0x21b   :  { %1323 = vset.pattern.permute.xlu1 %v1436_v6  ;;  %1322 = vset.pattern.permute.xlu0 %v1436_v6 }
 0x21c   :  { %v1794_v62 = vpop.permute.xlu1 %572  ;;  %v595_v20 = vpop.permute.xlu0 %594 }
 0x21d   :  { %v614_v49 = vmul.f32 %v595_v20, %v1757_v14 }
 0x21e   :  { %549 = vrot.lane.b32.xlu0 %v1751_v55, %s1427_s2  ;;  %525 = vrot.lane.b32.xlu1 %v1757_v14, %s1425_s9 }
 0x220   :  { %v599_v16 = vpop.permute.xlu1 %598  ;;  %v603_v21 = vpop.permute.xlu0 %602 }
 0x221   :  { %v616_v6 = vmul.f32 %v603_v21, %v1771_v37 }
 0x222   :  { %541 = vrot.lane.b32.xlu1 %v1749_v50, %s1427_s2  ;;  %698 = vperm.xlu0 %1322, %v1512_v2  }
 0x224   :  { %v1801_v19 = vpop.permute.xlu1 %638  ;;  %v1814_v24 = vpop.permute.xlu0 %610 }
 0x226   :  { %543 = vrot.lane.b32.xlu1 %v1757_v14, %s1427_s2  ;;  %710 = vperm.xlu0 %1322, %v1526_v4  }
 0x228   :  { %v663_v35 = vpop.permute.xlu1 %662 }
 0x22a   :  { %527 = vrot.lane.b32.xlu1 %v1767_v57, %s1425_s9  ;;  %718 = vperm.xlu0 %1322, %v1553_v9  }
 0x22c   :  { %v1808_v17 = vpop.permute.xlu1 %580 }
 0x22e   :  { %529 = vrot.lane.b32.xlu1 %v1771_v37, %s1425_s9  ;;  %1327 = vset.pattern.permute.xlu0 %v1438_v59 }
 0x22f   :  { %919 = vperm.xlu0 %1327, %v1538_v7  }
 0x230   :  { %v607_v22 = vpop.permute.xlu1 %606 }
 0x232   :  { %545 = vrot.lane.b32.xlu1 %v1767_v57, %s1427_s2 }
 0x233   :  { %1328 = vset.pattern.permute.xlu0 %v1437_v54 }
 0x234   :  { %885 = vperm.xlu0 %1328, %v1519_v3   ;;  %v1812_v23 = vpop.permute.xlu1 %646 }
 0x236   :  { %547 = vrot.lane.b32.xlu1 %v1771_v37, %s1427_s2 }
 0x238   :  { %889 = vperm.xlu0 %1328, %v1538_v7   ;;  %v671_v32 = vpop.permute.xlu1 %670 }
 0x23a   :  { %533 = vrot.lane.b32.xlu1 %v1779_v0, %s1425_s9 }
 0x23c   :  { %901 = vperm.xlu0 %1328, %v1553_v9   ;;  %v1816_v40 = vpop.permute.xlu1 %682 }
 0x23e   :  { %551 = vrot.lane.b32.xlu1 %v1779_v0, %s1427_s2 }
 0x242   :  { %702 = vperm.xlu1 %1323, %v1519_v3  }
 0x246   :  { %706 = vperm.xlu1 %1323, %v1538_v7  }
 0x24a   :  { %714 = vperm.xlu1 %1323, %v1546_v8  }
 0x24e   :  { %1324 = vset.pattern.permute.xlu1 %v1437_v54 }
 0x24f   :  { %881 = vperm.xlu1 %1324, %v1512_v2  }
 0x253   :  { %1325 = vset.pattern.permute.xlu1 %v1438_v59 }
 0x254   :  { %911 = vperm.xlu1 %1325, %v1512_v2  }
 0x258   :  { %915 = vperm.xlu1 %1325, %v1519_v3  }
 0x25c   :  { %1326 = vset.pattern.permute.xlu1 %v1437_v54 }
 0x25d   :  { %893 = vperm.xlu1 %1326, %v1526_v4  }
 0x261   :  { %1329 = vset.pattern.permute.xlu1 %v1438_v59 }
 0x262   :  { %923 = vperm.xlu1 %1329, %v1526_v4   ;;  %v635_v4 = vpop.permute.xlu0 %634 }
 0x266   :  { %1330 = vset.pattern.permute.xlu1 %v1437_v54  ;;  %v643_v34 = vpop.permute.xlu0 %642 }
 0x267   :  { %897 = vperm.xlu1 %1330, %v1546_v8  }
 0x26a   :  { %v667_v43 = vpop.permute.xlu0 %666 }
 0x26b   :  { %1331 = vset.pattern.permute.xlu1 %v1438_v59 }
 0x26c   :  { %927 = vperm.xlu1 %1331, %v1546_v8  }
 0x26e   :  { %v675_v51 = vpop.permute.xlu0 %674 }
 0x270   :  { %931 = vperm.xlu1 %1331, %v1553_v9  }
 0x272   :  { %v679_v56 = vpop.permute.xlu0 %678 }
 0x28c   :  { %v524_v42 = vpop.permute.xlu1 %523  ;;  %v532_v63 = vpop.permute.xlu0 %531 }
 0x28d   :  { %v535_v46 = vmul.f32 %v1661_v39, %v524_v42 }
 0x28f   :  { %v583_v26 = vmul.f32 %v561_v11, %v535_v46 }
 0x290   :  { %v526_v47 = vpop.permute.xlu1 %525  ;;  %v550_v42 = vpop.permute.xlu0 %549 }
 0x291   :  { %v536_v8 = vmul.f32 %v1661_v39, %v526_v47  ;;  %v619_v25 = vadd.f32 %v613_v13, %v583_v26  ;;  %v557_v37 = vmul.f32 %v1671_v45, %v550_v42 }
 0x293   :  { %v584_v9 = vmul.f32 %v565_v5, %v536_v8  ;;  %v653_v26 = vmul.f32 %v643_v34, %v557_v37 }
 0x294   :  { %v542_v52 = vpop.permute.xlu1 %541 }
 0x295   :  { %v620_v29 = vadd.f32 %v614_v49, %v584_v9  ;;  %v553_v53 = vmul.f32 %v1671_v45, %v542_v52 }
 0x297   :  { %v649_v36 = vmul.f32 %v627_v10, %v553_v53 }
 0x298   :  { %v544_v44 = vpop.permute.xlu1 %543 }
 0x299   :  { %v655_v27 = vadd.f32 %v649_v36, %v619_v25  ;;  %v554_v48 = vmul.f32 %v1671_v45, %v544_v44  ;;  %v618_v25 = vmul.f32 %v1814_v24, %v1779_v0  ;;  %v91_v0 = vld [vmem:[#allocation5 + $0x8] sm:$0xff]  ;;  %v92_v24 = vld [vmem:[#allocation5 + $0x10] sm:$0xff] }
 0x29b   :  { %v650_v30 = vmul.f32 %v631_v31, %v554_v48  ;;  %v685_v14 = vadd.f32 %v663_v35, %v655_v27  ;;  %v615_v31 = vmul.f32 %v599_v16, %v1767_v57  ;;  %v617_v16 = vmul.f32 %v607_v22, %v1751_v55 }
 0x29c   :  { %v528_v33 = vpop.permute.xlu1 %527 }
 0x29d   :  { %v656_v58 = vadd.f32 %v650_v30, %v620_v29  ;;  %v537_v60 = vmul.f32 %v1661_v39, %v528_v33  ;;  %v691_v5 = vmax.f32 %v685_v14, 0.0  ;;  %v1441_v33 = vmov 14  }
 0x29e   :  { %1333 = vset.pattern.permute.xlu1 %v1441_v33  ;;  %1332 = vset.pattern.permute.xlu0 %v1441_v33 }
 0x29f   :  { %v686_v61 = vadd.f32 %v667_v43, %v656_v58  ;;  %v585_v10 = vmul.f32 %v569_v18, %v537_v60  ;;  %v539_v43 = vmul.f32 %v1661_v39, %v532_v63  ;;  %945 = vperm.xlu1 %1333, %v1519_v3   ;;  %941 = vperm.xlu0 %1332, %v1512_v2  }
 0x2a0   :  { %v530_v41 = vpop.permute.xlu1 %529 }
 0x2a1   :  { %v538_v50 = vmul.f32 %v1661_v39, %v530_v41  ;;  %v692_v12 = vmax.f32 %v686_v61, 0.0  ;;  %v621_v46 = vadd.f32 %v615_v31, %v585_v10  ;;  %v587_v21 = vmul.f32 %v1805_v15, %v539_v43  ;;  %v699_v14 = vpop.permute.xlu0 %698 }
 0x2a3   :  { %v586_v54 = vmul.f32 %v1794_v62, %v538_v50  ;;  %v1231_v59 = vpack.c.bf16 %v692_v12, %v691_v5  ;;  %v623_v29 = vadd.f32 %v617_v16, %v587_v21  ;;  %949 = vperm.xlu1 %1333, %v1538_v7  }
 0x2a4   :  { %v546_v11 = vpop.permute.xlu1 %545 }
 0x2a5   :  { %v622_v20 = vadd.f32 %v616_v6, %v586_v54  ;;  %v555_v35 = vmul.f32 %v1671_v45, %v546_v11  ;;  %1232 = vmatprep.subr.bf16.mxu1 %v1231_v59  ;;  %v659_v44 = vadd.f32 %v653_v26, %v623_v29  ;;  %v711_v5 = vpop.permute.xlu0 %710 }
 0x2a6   :  { %1234 = vmatpush3.bf16.msra.mxu1 %v1231_v59 }
 0x2a7   :  { %v651_v47 = vmul.f32 %v635_v4, %v555_v35 }
 0x2a8   :  { %v548_v8 = vpop.permute.xlu1 %547 }
 0x2a9   :  { %v657_v18 = vadd.f32 %v651_v47, %v621_v46  ;;  %v556_v62 = vmul.f32 %v1671_v45, %v548_v8  ;;  %v719_v43 = vpop.permute.xlu0 %718 }
 0x2ab   :  { %v652_v57 = vmul.f32 %v1801_v19, %v556_v62  ;;  %v687_v13 = vadd.f32 %v671_v32, %v657_v18 }
 0x2ac   :  { %v534_v49 = vpop.permute.xlu1 %533 }
 0x2ad   :  { %v658_v9 = vadd.f32 %v652_v57, %v622_v20  ;;  %v540_v52 = vmul.f32 %v1661_v39, %v534_v49  ;;  %v693_v19 = vmax.f32 %v687_v13, 0.0  ;;  %v689_v39 = vadd.f32 %v679_v56, %v659_v44  ;;  %v95_v56 = vld [vmem:[#allocation5 + $0x28] sm:$0xff] }
 0x2af   :  { %v588_v4 = vmul.f32 %v1808_v17, %v540_v52  ;;  %v688_v53 = vadd.f32 %v675_v51, %v658_v9  ;;  %v695_v32 = vmax.f32 %v689_v39, 0.0 }
 0x2b0   :  { %v552_v36 = vpop.permute.xlu1 %551 }
 0x2b1   :  { %v558_v15 = vmul.f32 %v1671_v45, %v552_v36  ;;  %v694_v27 = vmax.f32 %v688_v53, 0.0  ;;  %v624_v55 = vadd.f32 %v618_v25, %v588_v4  ;;  %v93_v45 = vld [vmem:[#allocation5 + $0x18] sm:$0xff] }
 0x2b3   :  { %v654_v22 = vmul.f32 %v1812_v23, %v558_v15  ;;  %v1235_v34 = vpack.c.bf16 %v694_v27, %v693_v19  ;;  %v94_v23 = vld [vmem:[#allocation5 + $0x20] sm:$0xff] }
 0x2b5   :  { %v660_v48 = vadd.f32 %v654_v22, %v624_v55  ;;  %1236 = vmatprep.subr.bf16.mxu1 %v1235_v34 }
 0x2b6   :  { %1238 = vmatpush3.bf16.msra.mxu1 %v1235_v34 }
 0x2b7   :  { %v690_v17 = vadd.f32 %v1816_v40, %v660_v48  ;;  %v1439_v40 = vmov 0.0|0.0  }
 0x2b8   :  { %1243 = vmatprep.subr.bf16.mxu0 %v1439_v40 }
 0x2b9   :  { %v696_v51 = vmax.f32 %v690_v17, 0.0 }
 0x2bb   :  { %v1239_v30 = vpack.c.bf16 %v696_v51, %v695_v32  ;;  %v920_v32 = vpop.permute.xlu0 %919 }
 0x2bd   :  { %1240 = vmatprep.subr.bf16.mxu1 %v1239_v30 }
 0x2be   :  { %1242 = vmatpush3.bf16.msra.mxu1 %v1239_v30 }
 0x2bf   :  { %1252 = vmatprep.subr.bf16.mxu1 %v1439_v40 }
 0x2c1   :  { %1190 = vmatmul.mubr.msk.f32.vlgmr.msra.gmra.mrb[0].mxu1 %vm303_vm0, %v91_v0  ;;  %v703_v58 = vpop.permute.xlu1 %702 }
 0x2c2   :  { %1192 = vmatprep.mubr.msk.f32.mxu1 %vm303_vm0, %v92_v24 }
 0x2c5   :  { %1193 = vmatmul.mubr.msk.f32.gmra.mrb[2].mxu1 %vm303_vm0, %v93_v45  ;;  %v707_v60 = vpop.permute.xlu1 %706 }
 0x2c6   :  { %1195 = vmatprep.mubr.msk.f32.mxu1 %vm303_vm0, %v94_v23 }
 0x2c9   :  { %1196 = vmatmul.mubr.msk.f32.gmra.mrb[4].mxu1 %vm303_vm0, %v95_v56  ;;  %v715_v6 = vpop.permute.xlu1 %714 }
 0x2ca   :  { %1213 = vmatprep.mubr.msk.f32.mxu1 %vm1440_vm3, %v1432_v38 }
 0x2ce   :  { %v882_v31 = vpop.permute.xlu1 %881 }
 0x2d3   :  { %v912_v49 = vpop.permute.xlu1 %911 }
 0x2d7   :  { %v916_v25 = vpop.permute.xlu1 %915 }
 0x2dc   :  { %v894_v22 = vpop.permute.xlu1 %893 }
 0x2e1   :  { %v924_v45 = vpop.permute.xlu1 %923 }
 0x394   :  { %v1191_v61 = vpop.f32.mrb[0].mxu1 }
 0x395   :  { %v1857_v63 = vadd.f32 %v1191_v61, %v703_v58  ;;  %v805_v41 = vpop.f32.mrb[1].mxu1  ;;  %v886_v61 = vpop.permute.xlu0 %885 }
 0x396   :  { %v1859_v50 = vadd.f32 %v805_v41, %v699_v14  ;;  %v898_v41 = vpop.permute.xlu1 %897 }
 0x397   :  { %v847_v12 = vmul.f32 %v1857_v63, %v1857_v63 }
 0x398   :  { %v834_v3 = vadd.f32 %v1857_v63, %v1859_v50  ;;  %v846_v2 = vmul.f32 %v1859_v50, %v1859_v50  ;;  %v1194_v7 = vpop.f32.mrb[2].mxu1 }
 0x399   :  { %v821_v10 = vadd.f32 %v1194_v7, %v711_v5  ;;  %v815_v54 = vpop.f32.mrb[3].mxu1  ;;  %v890_v5 = vpop.permute.xlu0 %889 }
 0x39a   :  { %v852_v59 = vadd.f32 %v847_v12, %v846_v2  ;;  %v816_v11 = vadd.f32 %v815_v54, %v707_v60  ;;  %v928_v12 = vpop.permute.xlu1 %927 }
 0x39b   :  { %v849_v46 = vmul.f32 %v821_v10, %v821_v10 }
 0x39c   :  { %v835_v20 = vadd.f32 %v834_v3, %v816_v11  ;;  %v848_v35 = vmul.f32 %v816_v11, %v816_v11  ;;  %v1197_v42 = vpop.f32.mrb[4].mxu1 }
 0x39d   :  { %v825_v47 = vpop.f32.mrb[5].mxu1  ;;  %v831_v37 = vadd.f32 %v1197_v42, %v719_v43 }
 0x39e   :  { %v853_v8 = vadd.f32 %v852_v59, %v848_v35  ;;  %v826_v18 = vadd.f32 %v825_v47, %v715_v6  ;;  %v836_v62 = vadd.f32 %v835_v20, %v821_v10  ;;  %v932_v42 = vpop.permute.xlu1 %931 }
 0x39f   :  { %v851_v26 = vmul.f32 %v831_v37, %v831_v37 }
 0x3a0   :  { %v837_v21 = vadd.f32 %v836_v62, %v826_v18  ;;  %v850_v57 = vmul.f32 %v826_v18, %v826_v18  ;;  %v854_v16 = vadd.f32 %v853_v8, %v849_v46 }
 0x3a2   :  { %v838_v9 = vadd.f32 %v837_v21, %v831_v37  ;;  %v855_v52 = vadd.f32 %v854_v16, %v850_v57 }
 0x3a4   :  { %v839_v13 = vrot.slane %v838_v9, 4  ;;  %v856_v29 = vadd.f32 %v855_v52, %v851_v26  ;;  %v1045_v52 = vshrl.u32 %v58_v28, 7 }
 0x3a6   :  { %v840_v4 = vadd.f32 %v839_v13, %v838_v9  ;;  %v857_v53 = vrot.slane %v856_v29, 4  ;;  %v1041_v9 = vld [vmem:[%s1910_s1] sm:$0x1]  ;;  %v1046_v13 = vsub.s32 0, %v1045_v52  ;;  %s1442_s1 = smov [#allocation7]  }
 0x3a7   :  { %vm1042_vm4 = vcmp.gt.f32.partialorder %v1041_v9, 0.5 }
 0x3a8   :  { %v841_v36 = vrot.slane %v840_v4, 2  ;;  %v858_v44 = vadd.f32 %v857_v53, %v856_v29  ;;  %v1043_v29 = vsel %vm1042_vm4, 1, %v1423_v1  ;;  %v946_v53 = vpop.permute.xlu1 %945 }
 0x3aa   :  { %v842_v15 = vadd.f32 %v841_v36, %v840_v4  ;;  %v859_v19 = vrot.slane %v858_v44, 2  ;;  %v1047_v4 = vrot.slane %v1043_v29, %v1046_v13 }
 0x3ac   :  { %v843_v27 = vrot.slane %v842_v15, 1  ;;  %v860_v55 = vadd.f32 %v859_v19, %v858_v44  ;;  %vm1048_vm5 = vcmp.eq.s32.totalorder %v1047_v4, 1 }
 0x3ae   :  { %v844_v34 = vadd.f32 %v843_v27, %v842_v15  ;;  %v861_v48 = vrot.slane %v860_v55, 1 }
 0x3b0   :  { %v845_v39 = vmul.f32 0.020833334, %v844_v34  ;;  %v862_v17 = vadd.f32 %v861_v48, %v860_v55  ;;  %v950_v34 = vpop.permute.xlu1 %949 }
 0x3b2   :  { %v863_v51 = vmul.f32 0.020833334, %v862_v17  ;;  %v864_v30 = vmul.f32 %v845_v39, %v845_v39  ;;  %v866_v0 = vsub.f32 %v1859_v50, %v845_v39  ;;  %v869_v24 = vsub.f32 %v821_v10, %v845_v39  ;;  %v902_v50 = vpop.permute.xlu0 %901 }
 0x3b3   :  { %v867_v23 = vsub.f32 %v1857_v63, %v845_v39  ;;  %v870_v56 = vsub.f32 %v826_v18, %v845_v39  ;;  %v868_v33 = vsub.f32 %v816_v11, %v845_v39  ;;  %v871_v58 = vsub.f32 %v831_v37, %v845_v39 }
 0x3b4   :  { %v865_v14 = vsub.f32 %v863_v51, %v864_v30 }
 0x3b6   :  { %v872_v60 = vadd.f32 1e-05, %v865_v14 }
 0x3b8   :  { %1336 = vrsqrt.f32 %v872_v60 }
 0x3c2   :  { %v1337_v6 = vpop.eup %1336 }
 0x3c3   :  { %v874_v3 = vmul.f32 %v1337_v6, %v866_v0  ;;  %v877_v2 = vmul.f32 %v1337_v6, %v869_v24  ;;  %v875_v7 = vmul.f32 %v1337_v6, %v867_v23  ;;  %v878_v54 = vmul.f32 %v1337_v6, %v870_v56 }
 0x3c4   :  { %v876_v10 = vmul.f32 %v1337_v6, %v868_v33  ;;  %v879_v59 = vmul.f32 %v1337_v6, %v871_v58 }
 0x3c5   :  { %v904_v20 = vmul.f32 %v882_v31, %v874_v3  ;;  %v907_v63 = vmul.f32 %v894_v22, %v877_v2  ;;  %v905_v35 = vmul.f32 %v886_v61, %v875_v7  ;;  %v908_v11 = vmul.f32 %v898_v41, %v878_v54  ;;  %v97_v31 = vld [vmem:[%s1914_s5 + $0x8] sm:$0xff] }
 0x3c6   :  { %v906_v43 = vmul.f32 %v890_v5, %v876_v10  ;;  %v909_v46 = vmul.f32 %v902_v50, %v879_v59 }
 0x3c7   :  { %v934_v47 = vadd.f32 %v912_v49, %v904_v20  ;;  %v937_v8 = vadd.f32 %v924_v45, %v907_v63  ;;  %v935_v37 = vadd.f32 %v916_v25, %v905_v35  ;;  %v938_v18 = vadd.f32 %v928_v12, %v908_v11  ;;  %v96_v49 = vld [vmem:[%s1914_s5] sm:$0xff]  ;;  %v942_v25 = vpop.permute.xlu0 %941 }
 0x3c8   :  { %v936_v62 = vadd.f32 %v920_v32, %v906_v43  ;;  %v939_v21 = vadd.f32 %v932_v42, %v909_v46 }
 0x3c9   :  { %v1244_v57 = vpack.c.bf16 %v935_v37, %v934_v47 }
 0x3ca   :  { %v1247_v16 = vpack.c.bf16 %v937_v8, %v936_v62  ;;  %v1250_v26 = vpack.c.bf16 %v939_v21, %v938_v18 }
 0x3cb   :  { %1245 = vmatpush3.bf16.msra.mxu0 %v1244_v57  ;;  %1255 = vmatpush3.bf16.msra.mxu1 %v1244_v57 }
 0x3cc   :  { %1246 = vmatprep.subr.bf16.mxu0 %v1439_v40  ;;  %1253 = vmatprep.subr.bf16.mxu1 %v1439_v40 }
 0x3cf   :  { %1248 = vmatpush3.bf16.msra.mxu0 %v1247_v16  ;;  %1256 = vmatpush3.bf16.msra.mxu1 %v1247_v16 }
 0x3d0   :  { %1249 = vmatprep.subr.bf16.mxu0 %v1439_v40  ;;  %1254 = vmatprep.subr.bf16.mxu1 %v1439_v40  ;;  %v98_v40 = vld [vmem:[%s1914_s5 + $0x10] sm:$0x3]  ;;  %s1093_s5 = sshll.u32 %s1442_s1, 4  ;;  %s1094_s5 = int_to_ptr.vmem [resolvable:$true] %s1093_s5 }
 0x3d1   :  { %s1390_s29 = scalar_lea.vmem %s1094_s5, 384  ;;  %p1395_p3 = scmp.lt.s32.totalorder %s1094_s5, %s1094_s5 }
 0x3d2   :  { %p1391_p2 = scmp.ne.s32.totalorder %s1094_s5, %s1390_s29  ;;  %p1396_p4 = scmp.lt.s32.totalorder %s1390_s29, %s1390_s29 }
 0x3d3   :  { %1251 = vmatpush3.bf16.msra.mxu0 %v1250_v26  ;;  %1257 = vmatpush3.bf16.msra.mxu1 %v1250_v26 }
 0x3d4   :  { %p1397_p5 = por %p1396_p4, %p1395_p3 }
 0x3d6   :  { %1214 = vmatmul.mubr.msk.f32.vlgmr.msra.gmra.mrb[6].mxu1 %vm303_vm0, %v97_v31  ;;  %1211 = vmatmul.mubr.msk.f32.vlgmr.msra.gmra.mrb[6].mxu0 %vm303_vm0, %v96_v49  ;;  %p1398_p6 = pnand %p1397_p5, %p1391_p2 }
 0x3d7   :  { %1216 = vmatprep.mubr.msk.f32.mxu1 %vm1440_vm3, %v1432_v38 }
 0x3da   :  { %1217 = vmatmul.mubr.msk.f32.gmra.mrb[8].mxu1 %vm303_vm0, %v98_v40 }
 0x4a9   :  { %v1032_v38 = vpop.f32.mrb[6].mxu1  ;;  %v1027_v36 = vpop.f32.mrb[6].mxu0 }
 0x4aa   :  { %v1033_v44 = vadd.f32 %v1032_v38, %v946_v53  ;;  %v1028_v15 = vadd.f32 %v1027_v36, %v942_v25  ;;  %v1215_v19 = vpop.f32.mrb[7].mxu1  ;;  %v1212_v27 = vpop.f32.mrb[7].mxu0 }
 0x4ac   :  { %v1050_v55 = vsel %vm1048_vm5, %v1033_v44, -10000.0  ;;  %v1049_v22 = vsel %vm1048_vm5, %v1028_v15, -10000.0 }
 0x4ad   :  { %v1054_v48 = vmax.f32 %v1049_v22, %v1050_v55  ;;  %v1037_v39 = vpop.f32.mrb[8].mxu1 }
 0x4ae   :  { %v1038_v28 = vadd.f32 %v1037_v39, %v950_v34  ;;  %v1218_v17 = vpop.f32.mrb[9].mxu1 }
 0x4b0   :  { %v1051_v32 = vsel %vm1048_vm5, %v1038_v28, -10000.0 }
 0x4b1   :  { %v1053_v1 = vsel %vm1052_vm6, %v1051_v32, -inf }
 0x4b2   :  { %v1055_v51 = vmax.f32 %v1054_v48, %v1053_v1 }
 0x4b4   :  { %v1056_v30 = vrot.slane %v1055_v51, 4 }
 0x4b6   :  { %v1057_v0 = vmax.f32 %v1055_v51, %v1056_v30 }
 0x4b8   :  { %v1058_v24 = vrot.slane %v1057_v0, 2 }
 0x4ba   :  { %v1059_v45 = vmax.f32 %v1057_v0, %v1058_v24 }
 0x4bc   :  { %v1060_v23 = vrot.slane %v1059_v45, 1 }
 0x4be   :  { %v1061_v56 = vmax.f32 %v1059_v45, %v1060_v23 }
 0x4c0   :  { %v1062_v33 = vsub.f32 %v1049_v22, %v1061_v56  ;;  %v1063_v58 = vsub.f32 %v1050_v55, %v1061_v56  ;;  %v1064_v14 = vsub.f32 %v1051_v32, %v1061_v56 }
 0x4c2   :  { %v1065_v60 = vmul.f32 1.442695, %v1062_v33  ;;  %v1067_v61 = vmul.f32 1.442695, %v1063_v58  ;;  %v1069_v41 = vmul.f32 1.442695, %v1064_v14 }
 0x4c4   :  { %1338 = vpow2.f32 %v1065_v60 }
 0x4c5   :  { %1340 = vpow2.f32 %v1067_v61 }
 0x4c6   :  { %1342 = vpow2.f32 %v1069_v41 }
 0x4ce   :  { %v1339_v5 = vpop.eup %1338 }
 0x4cf   :  { %v1341_v12 = vpop.eup %1340 }
 0x4d0   :  { %v1343_v6 = vpop.eup %1342  ;;  %v1071_v3 = vadd.f32 %v1341_v12, %v1339_v5 }
 0x4d1   :  { %v1072_v2 = vsel %vm1052_vm6, %v1343_v6, 0.0 }
 0x4d2   :  { %v1073_v7 = vadd.f32 %v1072_v2, %v1071_v3 }
 0x4d4   :  { %v1074_v54 = vrot.slane %v1073_v7, 4 }
 0x4d6   :  { %v1075_v50 = vadd.f32 %v1074_v54, %v1073_v7 }
 0x4d8   :  { %v1076_v10 = vrot.slane %v1075_v50, 2 }
 0x4da   :  { %v1077_v59 = vadd.f32 %v1076_v10, %v1075_v50 }
 0x4dc   :  { %v1078_v20 = vrot.slane %v1077_v59, 1 }
 0x4de   :  { %v1079_v63 = vadd.f32 %v1078_v20, %v1077_v59 }
 0x4e0   :  { %1344 = vlog2.f32 %v1079_v63 }
 0x4ea   :  { %v1345_v35 = vpop.eup %1344 }
 0x4eb   :  { %v1081_v11 = vmul.f32 0.6931472, %v1345_v35 }
 0x4ed   :  { %v1084_v42 = vsub.f32 %v1064_v14, %v1081_v11  ;;  %v1082_v43 = vsub.f32 %v1062_v33, %v1081_v11  ;;  %v1083_v46 = vsub.f32 %v1063_v58, %v1081_v11 }
 0x4ef   :  { %1087 = vst [vmem:[#allocation7 + $0x10] sm:$0x3] %v1084_v42  ;;  %1085 = vst [vmem:[#allocation7] sm:$0xff] %v1082_v43 }
 0x4f0   :  { %1086 = vst [vmem:[#allocation7 + $0x8] sm:$0xff] %v1083_v46 }
 0x4f1   :  { %1401 = shalt.err (!%p1398_p6)
}
 0x4f2   :  { %s1402_s10 = scalar_lea.hbm %s1915_s6, 384 }
 0x4f3   :  { %p1403_p7 = scmp.ne.s32.totalorder %s1915_s6, %s1402_s10  ;;  %p1406_p8 = scmp.lt.u32.totalorder %s1402_s10, %s1915_s6 }
 0x4f5   :  { %p1408_p9 = pnand %p1406_p8, %p1403_p7 }
 0x4f7   :  { %1411 = shalt.err (!%p1408_p9)
}
 0x4f8   :  { %1099 = dma.vmem_to_hbm [thread:$0]  %s1094_s5, 384, %s1915_s6, [#allocation4], %s1419_s7, %s1419_s7, %s1420_s8  }
 0x4f9   :  { %1416 = dma.done.wait [#allocation4], 384  }
 0x4fa   :  { %1417 = vsyncadd [#allocation4], 4294966912 }
 0x4fb   :  { %1103 = vsyncpa [#allocation3], 1 }
 0x4fc   :  { %1104 = vsyncpa [#allocation6], 1 }
 0x4fd   :  { %1105 = vsyncpa [#allocation4], 1 }

</bundles_post_ra>
